<compile_context>
chip_gen: v7x
topology: tpu7x:2x2x1
jax: 0.10.0
libtpu: 0.0.40
codegen_flags: <defaults>
</compile_context>

<pallas_src>
import jax
import jax.numpy as jnp
from jax.experimental import pallas as pl
from jax.experimental.pallas import tpu as pltpu

EPSILON = 1e-12

# VMEM budget for live tile data (in + out double-buffered + f32 temps).
# Conservative enough for v7x (64 MiB physical / 32 MiB scoped default)
# while still giving ~256-512 row tiles at D=4096 f32.
_VMEM_TILE_BUDGET = 24 * 1024 * 1024
_VMEM_LIMIT_BYTES = 48 * 1024 * 1024
_MAX_ROW_TILE = 2048


def _layernorm_kernel(x_ref, w_ref, b_ref, o_ref):
    x = x_ref[...].astype(jnp.float32)            # (tile_rows, D)
    w = w_ref[...].astype(jnp.float32)            # (1, D)
    b = b_ref[...].astype(jnp.float32)            # (1, D)

    # center
    mean = jnp.mean(x, axis=-1, keepdims=True)    # (tile_rows, 1)
    c = x - mean

    # scale -- reproduces the module's (var + eps)**2 (NOT a sqrt).
    var = jnp.mean(c * c, axis=-1, keepdims=True)  # (tile_rows, 1)
    # 1/(var+eps)^2 computed with an exact divide on the (rows, 1) column
    # (cheap: tile_rows divides), then a broadcast multiply over the tile.
    inv = 1.0 / (var + EPSILON)
    scale = inv * inv
    out = (c * scale) * w + b

    o_ref[...] = out.astype(o_ref.dtype)


def _sublane_multiple(dtype):
    # Sub-32-bit dtypes pack along sublanes: min row tile grows accordingly.
    return {4: 8, 2: 16, 1: 32}.get(jnp.dtype(dtype).itemsize, 8)


def _auto_row_tile(D, dtype):
    m = _sublane_multiple(dtype)
    itemsize = jnp.dtype(dtype).itemsize
    # Per-row bytes: input + output blocks (double-buffered) + f32 compute temp.
    per_row = D * (2 * itemsize + 2 * itemsize + 4)
    tile = _VMEM_TILE_BUDGET // max(per_row, 1)
    tile = max(m, (tile // m) * m)
    return min(tile, _MAX_ROW_TILE)


def layer_norm(x, weight, bias, *, row_tile=None):
    """x: (..., D); weight, bias: (D,). Normalizes over the last axis."""
    orig_shape = x.shape
    D = orig_shape[-1]
    rows = 1
    for s in orig_shape[:-1]:
        rows *= s
    x2 = x.reshape(rows, D)
    w2 = weight.reshape(1, D)
    b2 = bias.reshape(1, D)

    m = _sublane_multiple(x.dtype)
    if row_tile is None:
        row_tile = _auto_row_tile(D, x.dtype)

    if row_tile >= rows:
        # Single block covering all rows (block == full dim -> always legal).
        row_tile = rows
        grid = 1
    else:
        # Tiled path: block rows must be a multiple of the sublane packing;
        # the ragged last block is handled (masked) by Pallas -- no padded
        # copy of x is materialized in HBM.
        row_tile = max(m, (row_tile // m) * m)
        grid = pl.cdiv(rows, row_tile)

    # TODO(synk): for production shapes with D < 128, pack 128/D rows per lane
    # block (segmented reductions) to avoid masked lane stores.
    out = pl.pallas_call(
        _layernorm_kernel,
        out_shape=jax.ShapeDtypeStruct((rows, D), x.dtype),
        grid_spec=pltpu.PrefetchScalarGridSpec(
            num_scalar_prefetch=0,
            grid=(grid,),
            in_specs=[
                pl.BlockSpec((row_tile, D), lambda i: (i, 0)),
                pl.BlockSpec((1, D), lambda i: (0, 0)),
                pl.BlockSpec((1, D), lambda i: (0, 0)),
            ],
            out_specs=pl.BlockSpec((row_tile, D), lambda i: (i, 0)),
        ),
        compiler_params=pltpu.CompilerParams(
            dimension_semantics=("parallel",),
            vmem_limit_bytes=_VMEM_LIMIT_BYTES,
        ),
    )(x2, w2, b2)

    return out.reshape(orig_shape)


# TODO(synk): conditional=True path (cond-dependent weight/bias via Linear
# layers) is not implemented in the kernel; default module config is
# non-conditional.


def _reference(x, weight, bias):
    mean = jnp.mean(x, axis=-1, keepdims=True)
    c = x - mean
    var = jnp.mean(c * c, axis=-1, keepdims=True)
    return c / ((var + EPSILON) ** 2) * weight + bias


if __name__ == "__main__":
    key = jax.random.PRNGKey(0)

    # --- small case matching the module defaults: batch=2, seq=8, hidden=32 ---
    B, S, D = 2, 8, 32
    x = jax.random.normal(key, (B, S, D), dtype=jnp.float32)
    weight = jnp.ones((D,), dtype=jnp.float32)   # nn.Parameter(torch.ones(input_dim))
    bias = jnp.zeros((D,), dtype=jnp.float32)    # nn.Parameter(torch.zeros(input_dim))

    out = layer_norm(x, weight, bias)
    jax.block_until_ready(out)
    assert out.shape == x.shape
    assert jnp.allclose(out, _reference(x, weight, bias), rtol=1e-5, atol=1e-5)

    # --- exercise the tiled + ragged-tail path (no padded copy of x) ---
    k2 = jax.random.PRNGKey(1)
    B2, S2, D2 = 2, 100, 256                     # 200 rows, not a multiple of 64
    x2 = jax.random.normal(k2, (B2, S2, D2), dtype=jnp.float32)
    w2 = jax.random.normal(jax.random.PRNGKey(2), (D2,), dtype=jnp.float32)
    b2 = jax.random.normal(jax.random.PRNGKey(3), (D2,), dtype=jnp.float32)

    out2 = layer_norm(x2, w2, b2, row_tile=64)
    jax.block_until_ready(out2)
    assert jnp.allclose(out2, _reference(x2, w2, b2), rtol=1e-5, atol=1e-5)

    print("KERNEL_OK")
</pallas_src>

<mosaic_0001>
module attributes {stable_mosaic.version = 11 : i64} {
  func.func @_layernorm_kernel(%arg0: i32, %arg1: memref<16x32xf32, #tpu.memory_space<vmem>>, %arg2: memref<1x32xf32, #tpu.memory_space<vmem>>, %arg3: memref<1x32xf32, #tpu.memory_space<vmem>>, %arg4: memref<16x32xf32, #tpu.memory_space<vmem>>) attributes {dimension_semantics = [#tpu.dimension_semantics<parallel>], iteration_bounds = array<i64: 1>, scalar_prefetch = 0 : i64, scratch_operands = 0 : i64, tpu.core_type = #tpu.core_type<tc>, window_params = [{transform_indices = @transform_0, window_bounds = array<i64: 16, 32>}, {pipeline_mode = #tpu.pipeline_mode<synchronous>, transform_indices = @transform_1, window_bounds = array<i64: 1, 32>}, {pipeline_mode = #tpu.pipeline_mode<synchronous>, transform_indices = @transform_2, window_bounds = array<i64: 1, 32>}, {transform_indices = @transform_3, window_bounds = array<i64: 16, 32>}]} {
    %c0 = arith.constant 0 : index
    %c0_0 = arith.constant 0 : index
    %0 = vector.load %arg1[%c0, %c0_0] : memref<16x32xf32, #tpu.memory_space<vmem>>, vector<16x32xf32>
    %c0_1 = arith.constant 0 : index
    %c0_2 = arith.constant 0 : index
    %1 = vector.load %arg2[%c0_1, %c0_2] : memref<1x32xf32, #tpu.memory_space<vmem>>, vector<1x32xf32>
    %c0_3 = arith.constant 0 : index
    %c0_4 = arith.constant 0 : index
    %2 = vector.load %arg3[%c0_3, %c0_4] : memref<1x32xf32, #tpu.memory_space<vmem>>, vector<1x32xf32>
    %cst = arith.constant dense<0.000000e+00> : vector<16xf32>
    %3 = vector.multi_reduction <add>, %0, %cst [1] : vector<16x32xf32> to vector<16xf32>
    %4 = vector.shape_cast %3 : vector<16xf32> to vector<16x1xf32>
    %cst_5 = arith.constant 3.200000e+01 : f32
    %5 = vector.broadcast %cst_5 : f32 to vector<16x1xf32>
    %6 = arith.divf %4, %5 : vector<16x1xf32>
    %7 = vector.broadcast %6 : vector<16x1xf32> to vector<16x32xf32>
    %8 = arith.subf %0, %7 : vector<16x32xf32>
    %9 = arith.mulf %8, %8 : vector<16x32xf32>
    %cst_6 = arith.constant dense<0.000000e+00> : vector<16xf32>
    %10 = vector.multi_reduction <add>, %9, %cst_6 [1] : vector<16x32xf32> to vector<16xf32>
    %11 = vector.shape_cast %10 : vector<16xf32> to vector<16x1xf32>
    %cst_7 = arith.constant 3.200000e+01 : f32
    %12 = vector.broadcast %cst_7 : f32 to vector<16x1xf32>
    %13 = arith.divf %11, %12 : vector<16x1xf32>
    %cst_8 = arith.constant 9.99999996E-13 : f32
    %14 = vector.broadcast %cst_8 : f32 to vector<16x1xf32>
    %15 = arith.addf %13, %14 : vector<16x1xf32>
    %cst_9 = arith.constant 1.000000e+00 : f32
    %16 = vector.broadcast %cst_9 : f32 to vector<16x1xf32>
    %17 = arith.divf %16, %15 : vector<16x1xf32>
    %18 = arith.mulf %17, %17 : vector<16x1xf32>
    %19 = vector.broadcast %18 : vector<16x1xf32> to vector<16x32xf32>
    %20 = arith.mulf %8, %19 : vector<16x32xf32>
    %21 = vector.broadcast %1 : vector<1x32xf32> to vector<16x32xf32>
    %22 = arith.mulf %20, %21 : vector<16x32xf32>
    %23 = vector.broadcast %2 : vector<1x32xf32> to vector<16x32xf32>
    %24 = arith.addf %22, %23 : vector<16x32xf32>
    %c0_10 = arith.constant 0 : index
    %c0_11 = arith.constant 0 : index
    %25 = vector.load %arg4[%c0_10, %c0_11] : memref<16x32xf32, #tpu.memory_space<vmem>>, vector<16x32xf32>
    tpu.vector_store %arg4[%c0_10, %c0_11], %24 {strides = array<i32>} : memref<16x32xf32, #tpu.memory_space<vmem>>, vector<16x32xf32>,
    return
  }
  func.func @transform_0(%arg0: i32) -> (i32, i32) {
    %c0_i32 = arith.constant 0 : i32
    %c0_i32_0 = arith.constant 0 : i32
    return %arg0, %c0_i32 : i32, i32
  }
  func.func @transform_1(%arg0: i32) -> (i32, i32) {
    %c0_i32 = arith.constant 0 : i32
    %c0_i32_0 = arith.constant 0 : i32
    %c0_i32_1 = arith.constant 0 : i32
    return %c0_i32, %c0_i32_0 : i32, i32
  }
  func.func @transform_2(%arg0: i32) -> (i32, i32) {
    %c0_i32 = arith.constant 0 : i32
    %c0_i32_0 = arith.constant 0 : i32
    %c0_i32_1 = arith.constant 0 : i32
    return %c0_i32, %c0_i32_0 : i32, i32
  }
  func.func @transform_3(%arg0: i32) -> (i32, i32) {
    %c0_i32 = arith.constant 0 : i32
    %c0_i32_0 = arith.constant 0 : i32
    return %arg0, %c0_i32 : i32, i32
  }
}

</mosaic_0001>

<bundles_post_ra>
// kernel: tpu_custom_call.1
= control target key start
LH: loop header
LB: loop body
LE: loop exit
PB: predicated region body
PF: predicated region fallthrough
CT: control target
= control target key end

     0   :  { %8 = vsyncpa [#allocation3], 0  ;;  %s224_s0 = inlined_call_operand.hbm [shape: f32[16,32], index: 0, kind: input, shape index: {}]   ;;  %s225_s1 = inlined_call_operand.vmem [shape: f32[1,32], index: 1, kind: input, shape index: {}]   ;;  %s226_s2 = inlined_call_operand.vmem [shape: f32[1,32], index: 2, kind: input, shape index: {}]   ;;  %s227_s3 = inlined_call_operand.hbm [shape: f32[16,32], index: 3, kind: output, shape index: {}]  }
   0x1   :  { %9 = vsyncpa [#allocation4], 0  ;;  %s158_s12 = smov [#allocation2]   ;;  %s110_s16 = scalar_lea.hbm %s224_s0, 256 }
   0x2   :  { %s15_s13 = sshll.u32 %s158_s12, 4  ;;  %p111_p0 = scmp.ne.s32.totalorder %s224_s0, %s110_s16  ;;  %s16_s13 = int_to_ptr.vmem [resolvable:$true] %s15_s13 }
   0x3   :  { %p114_p1 = scmp.lt.u32.totalorder %s110_s16, %s224_s0 }
   0x5   :  { %p116_p2 = pnand %p114_p1, %p111_p0 }
   0x7   :  { %119 = shalt.err (!%p116_p2)
}
   0x8   :  { %s120_s21 = scalar_lea.vmem %s16_s13, 256  ;;  %p125_p4 = scmp.lt.s32.totalorder %s16_s13, %s16_s13 }
   0x9   :  { %p121_p3 = scmp.ne.s32.totalorder %s16_s13, %s120_s21  ;;  %p126_p5 = scmp.lt.s32.totalorder %s120_s21, %s120_s21 }
   0xb   :  { %p127_p6 = por %p126_p5, %p125_p4 }
   0xd   :  { %p128_p7 = pnand %p127_p6, %p121_p3 }
   0xf   :  { %131 = shalt.err (!%p128_p7)
}
  0x10   :  { %s159_s22 = smov 128   ;;  %s160_s23 = smov 8  }
  0x11   :  { %21 = dma.hbm_to_vmem [thread:$0]  %s224_s0, 256, %s16_s13, [#allocation3], %s159_s22, %s159_s22, %s160_s23  }
  0x12   :  { %154 = dma.done.wait [#allocation3], 256  }
  0x13   :  { %155 = vsyncadd [#allocation3], 4294967040  ;;  %vm33_vm0 = vcmask 261120   ;;  %v29_v0 = vld [vmem:[#allocation2] sm:$0xff]  ;;  %v30_v1 = vld [vmem:[#allocation2 + $0x8] sm:$0xff]  ;;  %s161_s29 = smov [#allocation5]  }
  0x14   :  { %v34_v2 = vsel %vm33_vm0, %v29_v0, 0.0  ;;  %v37_v3 = vsel %vm33_vm0, %v30_v1, 0.0  ;;  %v100_v22 = vld [vmem:[%s225_s1] ss:$0 sm:$0xff]  ;;  %s88_s30 = sshll.u32 %s161_s29, 4  ;;  %s89_s30 = int_to_ptr.vmem [resolvable:$true] %s88_s30 }
  0x15   :  { %35 = vadd.xlane.f32.xlu0 %v34_v2  ;;  %v101_v25 = vld [vmem:[%s226_s2] ss:$0 sm:$0xff]  ;;  %s132_s1 = scalar_lea.vmem %s89_s30, 256  ;;  %p137_p9 = scmp.lt.s32.totalorder %s89_s30, %s89_s30 }
  0x16   :  { %p133_p8 = scmp.ne.s32.totalorder %s89_s30, %s132_s1  ;;  %p138_p10 = scmp.lt.s32.totalorder %s132_s1, %s132_s1 }
  0x18   :  { %p139_p11 = por %p138_p10, %p137_p9 }
  0x19   :  { %38 = vadd.xlane.f32.xlu0 %v37_v3 }
  0x1a   :  { %p140_p12 = pnand %p139_p11, %p133_p8 }
  0xa2   :  { %v36_v4 = vpop.xlane.xlu0 %35 }
  0xa3   :  { %v41_v5 = vmul.f32 0.03125, %v36_v4 }
  0xa5   :  { %v43_v6 = vsub.f32 %v29_v0, %v41_v5 }
  0xa6   :  { %v39_v7 = vpop.xlane.xlu0 %38 }
  0xa7   :  { %v42_v8 = vmul.f32 0.03125, %v39_v7  ;;  %v45_v9 = vmul.f32 %v43_v6, %v43_v6 }
  0xa9   :  { %v44_v10 = vsub.f32 %v30_v1, %v42_v8  ;;  %v47_v11 = vsel %vm33_vm0, %v45_v9, 0.0 }
  0xaa   :  { %48 = vadd.xlane.f32.xlu1 %v47_v11 }
  0xab   :  { %v46_v12 = vmul.f32 %v44_v10, %v44_v10 }
  0xad   :  { %v50_v13 = vsel %vm33_vm0, %v46_v12, 0.0 }
  0xae   :  { %51 = vadd.xlane.f32.xlu1 %v50_v13 }
 0x137   :  { %v49_v14 = vpop.xlane.xlu1 %48 }
 0x138   :  { %v53_v15 = vmul.f32 0.03125, %v49_v14 }
 0x13a   :  { %v55_v16 = vadd.f32 1e-12, %v53_v15 }
 0x13b   :  { %v52_v17 = vpop.xlane.xlu1 %51 }
 0x13c   :  { %106 = vrcp.f32 %v55_v16  ;;  %v54_v18 = vmul.f32 0.03125, %v52_v17 }
 0x13e   :  { %v56_v19 = vadd.f32 1e-12, %v54_v18 }
 0x140   :  { %108 = vrcp.f32 %v56_v19 }
 0x146   :  { %v107_v20 = vpop.eup %106 }
 0x147   :  { %v61_v21 = vmul.f32 %v107_v20, %v107_v20 }
 0x149   :  { %v63_v23 = vmul.f32 %v61_v21, %v43_v6 }
 0x14a   :  { %v109_v24 = vpop.eup %108 }
 0x14b   :  { %v71_v26 = vmul.f32 %v100_v22, %v63_v23  ;;  %v62_v27 = vmul.f32 %v109_v24, %v109_v24 }
 0x14d   :  { %v64_v28 = vmul.f32 %v62_v27, %v44_v10  ;;  %v79_v29 = vadd.f32 %v101_v25, %v71_v26 }
 0x14f   :  { %v72_v30 = vmul.f32 %v100_v22, %v64_v28  ;;  %81 = vst.msk [vmem:[#allocation5] sm:$0xff] %vm33_vm0, %v79_v29 }
 0x151   :  { %v80_v31 = vadd.f32 %v101_v25, %v72_v30 }
 0x153   :  { %82 = vst.msk [vmem:[#allocation5 + $0x8] sm:$0xff] %vm33_vm0, %v80_v31 }
 0x154   :  { %143 = shalt.err (!%p140_p12)
}
 0x155   :  { %s144_s5 = scalar_lea.hbm %s227_s3, 256 }
 0x156   :  { %p145_p13 = scmp.ne.s32.totalorder %s227_s3, %s144_s5  ;;  %p148_p0 = scmp.lt.u32.totalorder %s144_s5, %s227_s3 }
 0x158   :  { %p150_p1 = pnand %p148_p0, %p145_p13 }
 0x15a   :  { %153 = shalt.err (!%p150_p1)
}
 0x15b   :  { %94 = dma.vmem_to_hbm [thread:$0]  %s89_s30, 256, %s227_s3, [#allocation4], %s159_s22, %s159_s22, %s160_s23  }
 0x15c   :  { %156 = dma.done.wait [#allocation4], 256  }
 0x15d   :  { %157 = vsyncadd [#allocation4], 4294967040 }
 0x15e   :  { %98 = vsyncpa [#allocation3], 1 }
 0x15f   :  { %99 = vsyncpa [#allocation4], 1 }

</bundles_post_ra>
